<compile_context>
chip_gen: v6e
topology: v6e:2x2x1
jax: 0.10.0
libtpu: 0.0.40
codegen_flags: <defaults>
</compile_context>

<pallas_src>
import functools

import jax
import jax.numpy as jnp
from jax.experimental import pallas as pl
from jax.experimental.pallas import tpu as pltpu


# ---------------------------------------------------------------------------
# Kernel
# ---------------------------------------------------------------------------

def _residual_feature_net_kernel(x_ref, w_ref, t_ref, o_ref, *, offs, cdt):
    """Fused forward pass.

    w_ref: packed weight slab (sum_rows, 128), dtype = cdt (e.g. bf16).
    t_ref: packed shift slab  (8, 128), f32.
    offs:  static (row_offset, rows) per layer inside the weight slab.
    """

    def mm(act, i):
        r0, rows = offs[i]
        w = w_ref[r0:r0 + rows, :]                      # static slice: free view
        return (jnp.dot(act.astype(cdt), w,
                        preferred_element_type=jnp.float32)
                + t_ref[i:i + 1, :])                    # f32 bias/BN shift

    x = x_ref[...]                                      # (tb, d_in_pad) bf16

    # input_expansion: Linear + BN -> ReLU (Dropout = identity in eval)
    h = jnp.maximum(mm(x, 0), 0.0)

    # residual_block1: Linear+BN -> ReLU -> Linear+BN, then residual add+ReLU
    r1 = jnp.maximum(mm(h, 1), 0.0)
    r1 = mm(r1, 2)
    h = jnp.maximum(h + r1, 0.0)

    # feature importance gating: Linear -> Sigmoid, elementwise multiply (f32)
    h = h * jax.nn.sigmoid(mm(h, 3))

    # Fused stage: one 128-wide matmul whose cols [0,64) = skip_projection(h)
    # and cols [64,128) = residual_block2 first Linear+BN (pre-activation).
    g = mm(h, 4)
    r2 = mm(jnp.maximum(g, 0.0), 5)                     # rb2 lin2+BN; real cols [0,64)
    # No lane mask needed: slab 6 rows [64,128) (and slab 7 rows [32,128)) are
    # exact zeros, so whatever lands in lanes >=64 of (g + r2) is annihilated
    # by the classifier matmuls.  (Invariant: see _pack_params zero padding.)
    h = jnp.maximum(g + r2, 0.0)

    # classifier: ReLU -> Linear(64,32)+BN -> ReLU -> Linear(32,out) (padded to 128)
    h = jnp.maximum(mm(h, 6), 0.0)
    o_ref[...] = mm(h, 7).astype(o_ref.dtype)           # lane-dense 128-wide store


# ---------------------------------------------------------------------------
# Wrapper: padding, weight fusion/packing, pallas_call
# ---------------------------------------------------------------------------

def _round_up(x, m):
    return ((x + m - 1) // m) * m


def _choose_tile_b(B, *, cap=512, split_threshold=256, align=16):
    """Padding-aware batch tile: smallest #steps with tiles <= cap, and >=2
    steps for large batches so v7x's two TensorCores both get work."""
    n_steps = max(1, -(-B // cap))
    if n_steps == 1 and B > split_threshold:
        n_steps = 2                                     # megacore split (v7x)
    return _round_up(-(-B // n_steps), align)


def _pack_params(folded_params, d_in_pad, matmul_dtype):
    """Fuse + zero-pad the 9 folded layers into one weight slab + one shift slab."""
    ((w1, t1), (w2, t2), (w3, t3), (w4, t4), (w5, t5),
     (w6, t6), (w7, t7), (w8, t8), (w9, t9)) = folded_params

    def pad_w(w, rows=128, cols=128, r0=0, c0=0):
        out = jnp.zeros((rows, cols), jnp.float32)
        return out.at[r0:r0 + w.shape[0], c0:c0 + w.shape[1]].set(w)

    def pad_t(t, cols=128):
        t = t.reshape(1, -1)
        out = jnp.zeros((1, cols), jnp.float32)
        return out.at[:, :t.shape[1]].set(t)

    weights = [
        pad_w(w1, rows=d_in_pad),                   # 0 input_expansion
        w2, w3, w4,                                 # 1-3 (already 128x128)
        jnp.concatenate([w7, w5], axis=1),          # 4 fused [skip_proj | rb2 lin1]
        pad_w(w6, r0=64, c0=0),                     # 5 rb2 lin2: in [64,128) -> out [0,64)
        pad_w(w8, r0=0, c0=0),                      # 6 classifier lin1 (64->32); rows [64,128) EXACT zero
        pad_w(w9, r0=0, c0=0),                      # 7 classifier lin2 (32->out); rows [32,128) EXACT zero
    ]
    shifts = [
        pad_t(t1), pad_t(t2), pad_t(t3), pad_t(t4),
        jnp.concatenate([t7.reshape(1, -1), t5.reshape(1, -1)], axis=1),
        pad_t(t6), pad_t(t8), pad_t(t9),
    ]

    offs, r = [], 0
    for w in weights:
        offs.append((r, w.shape[0]))
        r += w.shape[0]

    w_slab = jnp.concatenate(weights, axis=0).astype(matmul_dtype)
    t_slab = jnp.concatenate(shifts, axis=0).astype(jnp.float32)
    return w_slab, t_slab, tuple(offs)


def residual_feature_net(x, folded_params, *, tile_b=None,
                         matmul_dtype=jnp.bfloat16, out_dtype=jnp.float32):
    """x: (B, input_dim) float32.  folded_params: list of 9 (W_eff, shift) pairs."""
    B, d_in = x.shape
    out_dim = folded_params[-1][0].shape[1]
    d_in_pad = _round_up(d_in, 16)                  # bf16 sublane alignment only

    if tile_b is None:
        tile_b = _choose_tile_b(B)
    tile_b = _round_up(tile_b, 16)
    b_pad = _round_up(B, tile_b)

    x_c = x.astype(matmul_dtype)                    # halve input DMA (bf16)
    if b_pad != B or d_in_pad != d_in:
        x_c = jnp.pad(x_c, ((0, b_pad - B), (0, d_in_pad - d_in)))

    w_slab, t_slab, offs = _pack_params(folded_params, d_in_pad, matmul_dtype)

    kernel = functools.partial(_residual_feature_net_kernel,
                               offs=offs, cdt=matmul_dtype)

    total_k_rows = d_in_pad + 7 * 128
    cost = pl.CostEstimate(
        flops=2 * b_pad * 128 * total_k_rows,
        transcendentals=b_pad * 128,                # sigmoid
        bytes_accessed=(b_pad * d_in_pad * 2 + w_slab.size * 2
                        + t_slab.size * 4 + b_pad * 128 * 4),
    )

    out = pl.pallas_call(
        kernel,
        out_shape=jax.ShapeDtypeStruct((b_pad, 128), out_dtype),
        grid_spec=pltpu.PrefetchScalarGridSpec(
            num_scalar_prefetch=0,
            grid=(b_pad // tile_b,),
            in_specs=[
                pl.BlockSpec((tile_b, d_in_pad), lambda i: (i, 0)),
                pl.BlockSpec(w_slab.shape, lambda i: (0, 0)),   # constant block
                pl.BlockSpec(t_slab.shape, lambda i: (0, 0)),   # constant block
            ],
            out_specs=pl.BlockSpec((tile_b, 128), lambda i: (i, 0)),
        ),
        compiler_params=pltpu.CompilerParams(
            dimension_semantics=("parallel",)),
        cost_estimate=cost,
    )(x_c, w_slab, t_slab)

    return out[:B, :out_dim]


# ---------------------------------------------------------------------------
# Deterministic parameter construction (synthetic; mirrors __init__ shapes).
# ---------------------------------------------------------------------------

def _make_linear(key, d_in, d_out):
    kw, kb = jax.random.split(key)
    bound = 1.0 / jnp.sqrt(d_in)
    w = jax.random.uniform(kw, (d_in, d_out), jnp.float32, -bound, bound)
    b = jax.random.uniform(kb, (d_out,), jnp.float32, -bound, bound)
    return w, b


def _make_bn(key, d):
    k1, k2, k3, k4 = jax.random.split(key, 4)
    gamma = 1.0 + 0.1 * jax.random.normal(k1, (d,), jnp.float32)
    beta = 0.1 * jax.random.normal(k2, (d,), jnp.float32)
    rmean = 0.05 * jax.random.normal(k3, (d,), jnp.float32)
    rvar = 1.0 + 0.1 * jax.random.uniform(k4, (d,), jnp.float32)
    return gamma, beta, rmean, rvar


def _fold(w, b, bn=None, eps=1e-5):
    """Fold Linear bias (and optional eval-mode BN) into (W_eff, shift)."""
    if bn is None:
        return w, b.reshape(1, -1)
    gamma, beta, rmean, rvar = bn
    s = gamma / jnp.sqrt(rvar + eps)
    w_eff = w * s[None, :]
    shift = s * (b - rmean) + beta
    return w_eff, shift.reshape(1, -1)


def make_params(key, input_dim, output_dim):
    keys = jax.random.split(key, 18)
    layers = []
    w, b = _make_linear(keys[0], input_dim, 128)          # 1. input_expansion
    layers.append(_fold(w, b, _make_bn(keys[1], 128)))
    w, b = _make_linear(keys[2], 128, 128)                # 2. residual_block1 lin1
    layers.append(_fold(w, b, _make_bn(keys[3], 128)))
    w, b = _make_linear(keys[4], 128, 128)                # 3. residual_block1 lin2
    layers.append(_fold(w, b, _make_bn(keys[5], 128)))
    w, b = _make_linear(keys[6], 128, 128)                # 4. feature_importance
    layers.append(_fold(w, b))
    w, b = _make_linear(keys[7], 128, 64)                 # 5. residual_block2 lin1
    layers.append(_fold(w, b, _make_bn(keys[8], 64)))
    w, b = _make_linear(keys[9], 64, 64)                  # 6. residual_block2 lin2
    layers.append(_fold(w, b, _make_bn(keys[10], 64)))
    w, b = _make_linear(keys[11], 128, 64)                # 7. skip_projection
    layers.append(_fold(w, b))
    w, b = _make_linear(keys[12], 64, 32)                 # 8. classifier lin1
    layers.append(_fold(w, b, _make_bn(keys[13], 32)))
    w, b = _make_linear(keys[14], 32, output_dim)         # 9. classifier lin2
    layers.append(_fold(w, b))
    return layers


def reference_forward(x, p, matmul_dtype=jnp.float32):
    """Pure-JAX reference with the same folded params (eval-mode semantics)."""
    def mm(a, w, t):
        return jnp.dot(a.astype(matmul_dtype), w.astype(matmul_dtype),
                       preferred_element_type=jnp.float32) + t
    (w1, t1), (w2, t2), (w3, t3), (w4, t4), (w5, t5), (w6, t6), (w7, t7), \
        (w8, t8), (w9, t9) = p
    h = jnp.maximum(mm(x, w1, t1), 0.0)
    r1 = jnp.maximum(mm(h, w2, t2), 0.0)
    r1 = mm(r1, w3, t3)
    h = jnp.maximum(h + r1, 0.0)
    h = h * jax.nn.sigmoid(mm(h, w4, t4))
    r2 = jnp.maximum(mm(h, w5, t5), 0.0)
    r2 = mm(r2, w6, t6)
    h = mm(h, w7, t7) + r2
    h = jnp.maximum(h, 0.0)
    h = jnp.maximum(mm(h, w8, t8), 0.0)
    return mm(h, w9, t9)


if __name__ == "__main__":
    B, INPUT_DIM, OUTPUT_DIM = 16, 32, 8
    key = jax.random.PRNGKey(0)
    kx, kp = jax.random.split(key)
    x = jax.random.normal(kx, (B, INPUT_DIM), jnp.float32)
    params = make_params(kp, INPUT_DIM, OUTPUT_DIM)

    out = residual_feature_net(x, params)          # bf16 MXU inputs, f32 accum
    out = jax.block_until_ready(out)

    ref_bf16 = reference_forward(x, params, jnp.bfloat16)
    ref_f32 = reference_forward(x, params, jnp.float32)

    assert out.shape == (B, OUTPUT_DIM)
    assert jnp.allclose(out, ref_bf16, atol=1e-2, rtol=1e-2), \
        "mismatch vs bf16-matmul reference"
    assert jnp.allclose(out, ref_f32, atol=5e-2, rtol=5e-2), \
        "mismatch vs f32 reference"

    print("KERNEL_OK")
</pallas_src>

<mosaic_0001>
module attributes {stable_mosaic.version = 11 : i64} {
  func.func @_residual_feature_net_kernel(%arg0: i32, %arg1: memref<16x32xbf16, #tpu.memory_space<vmem>>, %arg2: memref<928x128xbf16, #tpu.memory_space<vmem>>, %arg3: memref<8x128xf32, #tpu.memory_space<vmem>>, %arg4: memref<16x128xf32, #tpu.memory_space<vmem>>) attributes {dimension_semantics = [#tpu.dimension_semantics<parallel>], iteration_bounds = array<i64: 1>, scalar_prefetch = 0 : i64, scratch_operands = 0 : i64, tpu.core_type = #tpu.core_type<tc>, window_params = [{transform_indices = @transform_0, window_bounds = array<i64: 16, 32>}, {pipeline_mode = #tpu.pipeline_mode<synchronous>, transform_indices = @transform_1, window_bounds = array<i64: 928, 128>}, {pipeline_mode = #tpu.pipeline_mode<synchronous>, transform_indices = @transform_2, window_bounds = array<i64: 8, 128>}, {transform_indices = @transform_3, window_bounds = array<i64: 16, 128>}]} {
    %c0 = arith.constant 0 : index
    %c0_0 = arith.constant 0 : index
    %0 = vector.load %arg1[%c0, %c0_0] : memref<16x32xbf16, #tpu.memory_space<vmem>>, vector<16x32xbf16>
    %c0_1 = arith.constant 0 : index
    %c0_2 = arith.constant 0 : index
    %1 = vector.load %arg2[%c0_1, %c0_2] : memref<928x128xbf16, #tpu.memory_space<vmem>>, vector<32x128xbf16>
    %cst = arith.constant dense<0.000000e+00> : vector<16x128xf32>
    %2 = tpu.matmul %0, %1, %cst {dimension_numbers = #tpu.dot_dimension_numbers<[1], [0], [0], [1], [0, 0, 1, 1], [], []>} : vector<16x32xbf16>, vector<32x128xbf16>, vector<16x128xf32> -> vector<16x128xf32>
    %c0_3 = arith.constant 0 : index
    %c0_4 = arith.constant 0 : index
    %3 = vector.load %arg3[%c0_3, %c0_4] : memref<8x128xf32, #tpu.memory_space<vmem>>, vector<1x128xf32>
    %4 = vector.broadcast %3 : vector<1x128xf32> to vector<16x128xf32>
    %5 = arith.addf %2, %4 : vector<16x128xf32>
    %cst_5 = arith.constant 0.000000e+00 : f32
    %6 = vector.broadcast %cst_5 : f32 to vector<16x128xf32>
    %7 = arith.maximumf %5, %6 : vector<16x128xf32>
    %c32 = arith.constant 32 : index
    %c0_6 = arith.constant 0 : index
    %8 = vector.load %arg2[%c32, %c0_6] : memref<928x128xbf16, #tpu.memory_space<vmem>>, vector<128x128xbf16>
    %9 = arith.truncf %7 : vector<16x128xf32> to vector<16x128xbf16>
    %cst_7 = arith.constant dense<0.000000e+00> : vector<16x128xf32>
    %10 = tpu.matmul %9, %8, %cst_7 {dimension_numbers = #tpu.dot_dimension_numbers<[1], [0], [0], [1], [0, 0, 1, 1], [], []>} : vector<16x128xbf16>, vector<128x128xbf16>, vector<16x128xf32> -> vector<16x128xf32>
    %c1 = arith.constant 1 : index
    %c0_8 = arith.constant 0 : index
    %11 = vector.load %arg3[%c1, %c0_8] : memref<8x128xf32, #tpu.memory_space<vmem>>, vector<1x128xf32>
    %12 = vector.broadcast %11 : vector<1x128xf32> to vector<16x128xf32>
    %13 = arith.addf %10, %12 : vector<16x128xf32>
    %cst_9 = arith.constant 0.000000e+00 : f32
    %14 = vector.broadcast %cst_9 : f32 to vector<16x128xf32>
    %15 = arith.maximumf %13, %14 : vector<16x128xf32>
    %c160 = arith.constant 160 : index
    %c0_10 = arith.constant 0 : index
    %16 = vector.load %arg2[%c160, %c0_10] : memref<928x128xbf16, #tpu.memory_space<vmem>>, vector<128x128xbf16>
    %17 = arith.truncf %15 : vector<16x128xf32> to vector<16x128xbf16>
    %cst_11 = arith.constant dense<0.000000e+00> : vector<16x128xf32>
    %18 = tpu.matmul %17, %16, %cst_11 {dimension_numbers = #tpu.dot_dimension_numbers<[1], [0], [0], [1], [0, 0, 1, 1], [], []>} : vector<16x128xbf16>, vector<128x128xbf16>, vector<16x128xf32> -> vector<16x128xf32>
    %c2 = arith.constant 2 : index
    %c0_12 = arith.constant 0 : index
    %19 = vector.load %arg3[%c2, %c0_12] : memref<8x128xf32, #tpu.memory_space<vmem>>, vector<1x128xf32>
    %20 = vector.broadcast %19 : vector<1x128xf32> to vector<16x128xf32>
    %21 = arith.addf %18, %20 : vector<16x128xf32>
    %22 = arith.addf %7, %21 : vector<16x128xf32>
    %cst_13 = arith.constant 0.000000e+00 : f32
    %23 = vector.broadcast %cst_13 : f32 to vector<16x128xf32>
    %24 = arith.maximumf %22, %23 : vector<16x128xf32>
    %c288 = arith.constant 288 : index
    %c0_14 = arith.constant 0 : index
    %25 = vector.load %arg2[%c288, %c0_14] : memref<928x128xbf16, #tpu.memory_space<vmem>>, vector<128x128xbf16>
    %26 = arith.truncf %24 : vector<16x128xf32> to vector<16x128xbf16>
    %cst_15 = arith.constant dense<0.000000e+00> : vector<16x128xf32>
    %27 = tpu.matmul %26, %25, %cst_15 {dimension_numbers = #tpu.dot_dimension_numbers<[1], [0], [0], [1], [0, 0, 1, 1], [], []>} : vector<16x128xbf16>, vector<128x128xbf16>, vector<16x128xf32> -> vector<16x128xf32>
    %c3 = arith.constant 3 : index
    %c0_16 = arith.constant 0 : index
    %28 = vector.load %arg3[%c3, %c0_16] : memref<8x128xf32, #tpu.memory_space<vmem>>, vector<1x128xf32>
    %29 = vector.broadcast %28 : vector<1x128xf32> to vector<16x128xf32>
    %30 = arith.addf %27, %29 : vector<16x128xf32>
    %31 = arith.negf %30 : vector<16x128xf32>
    %32 = math.exp %31 : vector<16x128xf32>
    %cst_17 = arith.constant 1.000000e+00 : f32
    %33 = vector.broadcast %cst_17 : f32 to vector<16x128xf32>
    %34 = arith.addf %33, %32 : vector<16x128xf32>
    %35 = arith.divf %33, %34 : vector<16x128xf32>
    %36 = arith.mulf %24, %35 : vector<16x128xf32>
    %c416 = arith.constant 416 : index
    %c0_18 = arith.constant 0 : index
    %37 = vector.load %arg2[%c416, %c0_18] : memref<928x128xbf16, #tpu.memory_space<vmem>>, vector<128x128xbf16>
    %38 = arith.truncf %36 : vector<16x128xf32> to vector<16x128xbf16>
    %cst_19 = arith.constant dense<0.000000e+00> : vector<16x128xf32>
    %39 = tpu.matmul %38, %37, %cst_19 {dimension_numbers = #tpu.dot_dimension_numbers<[1], [0], [0], [1], [0, 0, 1, 1], [], []>} : vector<16x128xbf16>, vector<128x128xbf16>, vector<16x128xf32> -> vector<16x128xf32>
    %c4 = arith.constant 4 : index
    %c0_20 = arith.constant 0 : index
    %40 = vector.load %arg3[%c4, %c0_20] : memref<8x128xf32, #tpu.memory_space<vmem>>, vector<1x128xf32>
    %41 = vector.broadcast %40 : vector<1x128xf32> to vector<16x128xf32>
    %42 = arith.addf %39, %41 : vector<16x128xf32>
    %cst_21 = arith.constant 0.000000e+00 : f32
    %43 = vector.broadcast %cst_21 : f32 to vector<16x128xf32>
    %44 = arith.maximumf %42, %43 : vector<16x128xf32>
    %c544 = arith.constant 544 : index
    %c0_22 = arith.constant 0 : index
    %45 = vector.load %arg2[%c544, %c0_22] : memref<928x128xbf16, #tpu.memory_space<vmem>>, vector<128x128xbf16>
    %46 = arith.truncf %44 : vector<16x128xf32> to vector<16x128xbf16>
    %cst_23 = arith.constant dense<0.000000e+00> : vector<16x128xf32>
    %47 = tpu.matmul %46, %45, %cst_23 {dimension_numbers = #tpu.dot_dimension_numbers<[1], [0], [0], [1], [0, 0, 1, 1], [], []>} : vector<16x128xbf16>, vector<128x128xbf16>, vector<16x128xf32> -> vector<16x128xf32>
    %c5 = arith.constant 5 : index
    %c0_24 = arith.constant 0 : index
    %48 = vector.load %arg3[%c5, %c0_24] : memref<8x128xf32, #tpu.memory_space<vmem>>, vector<1x128xf32>
    %49 = vector.broadcast %48 : vector<1x128xf32> to vector<16x128xf32>
    %50 = arith.addf %47, %49 : vector<16x128xf32>
    %51 = arith.addf %42, %50 : vector<16x128xf32>
    %cst_25 = arith.constant 0.000000e+00 : f32
    %52 = vector.broadcast %cst_25 : f32 to vector<16x128xf32>
    %53 = arith.maximumf %51, %52 : vector<16x128xf32>
    %c672 = arith.constant 672 : index
    %c0_26 = arith.constant 0 : index
    %54 = vector.load %arg2[%c672, %c0_26] : memref<928x128xbf16, #tpu.memory_space<vmem>>, vector<128x128xbf16>
    %55 = arith.truncf %53 : vector<16x128xf32> to vector<16x128xbf16>
    %cst_27 = arith.constant dense<0.000000e+00> : vector<16x128xf32>
    %56 = tpu.matmul %55, %54, %cst_27 {dimension_numbers = #tpu.dot_dimension_numbers<[1], [0], [0], [1], [0, 0, 1, 1], [], []>} : vector<16x128xbf16>, vector<128x128xbf16>, vector<16x128xf32> -> vector<16x128xf32>
    %c6 = arith.constant 6 : index
    %c0_28 = arith.constant 0 : index
    %57 = vector.load %arg3[%c6, %c0_28] : memref<8x128xf32, #tpu.memory_space<vmem>>, vector<1x128xf32>
    %58 = vector.broadcast %57 : vector<1x128xf32> to vector<16x128xf32>
    %59 = arith.addf %56, %58 : vector<16x128xf32>
    %cst_29 = arith.constant 0.000000e+00 : f32
    %60 = vector.broadcast %cst_29 : f32 to vector<16x128xf32>
    %61 = arith.maximumf %59, %60 : vector<16x128xf32>
    %c800 = arith.constant 800 : index
    %c0_30 = arith.constant 0 : index
    %62 = vector.load %arg2[%c800, %c0_30] : memref<928x128xbf16, #tpu.memory_space<vmem>>, vector<128x128xbf16>
    %63 = arith.truncf %61 : vector<16x128xf32> to vector<16x128xbf16>
    %cst_31 = arith.constant dense<0.000000e+00> : vector<16x128xf32>
    %64 = tpu.matmul %63, %62, %cst_31 {dimension_numbers = #tpu.dot_dimension_numbers<[1], [0], [0], [1], [0, 0, 1, 1], [], []>} : vector<16x128xbf16>, vector<128x128xbf16>, vector<16x128xf32> -> vector<16x128xf32>
    %c7 = arith.constant 7 : index
    %c0_32 = arith.constant 0 : index
    %65 = vector.load %arg3[%c7, %c0_32] : memref<8x128xf32, #tpu.memory_space<vmem>>, vector<1x128xf32>
    %66 = vector.broadcast %65 : vector<1x128xf32> to vector<16x128xf32>
    %67 = arith.addf %64, %66 : vector<16x128xf32>
    %c0_33 = arith.constant 0 : index
    %c0_34 = arith.constant 0 : index
    %68 = vector.load %arg4[%c0_33, %c0_34] : memref<16x128xf32, #tpu.memory_space<vmem>>, vector<16x128xf32>
    tpu.vector_store %arg4[%c0_33, %c0_34], %67 {strides = array<i32>} : memref<16x128xf32, #tpu.memory_space<vmem>>, vector<16x128xf32>,
    return
  }
  func.func @transform_0(%arg0: i32) -> (i32, i32) {
    %c0_i32 = arith.constant 0 : i32
    %c0_i32_0 = arith.constant 0 : i32
    return %arg0, %c0_i32 : i32, i32
  }
  func.func @transform_1(%arg0: i32) -> (i32, i32) {
    %c0_i32 = arith.constant 0 : i32
    %c0_i32_0 = arith.constant 0 : i32
    %c0_i32_1 = arith.constant 0 : i32
    return %c0_i32, %c0_i32_0 : i32, i32
  }
  func.func @transform_2(%arg0: i32) -> (i32, i32) {
    %c0_i32 = arith.constant 0 : i32
    %c0_i32_0 = arith.constant 0 : i32
    %c0_i32_1 = arith.constant 0 : i32
    return %c0_i32, %c0_i32_0 : i32, i32
  }
  func.func @transform_3(%arg0: i32) -> (i32, i32) {
    %c0_i32 = arith.constant 0 : i32
    %c0_i32_0 = arith.constant 0 : i32
    return %arg0, %c0_i32 : i32, i32
  }
}

</mosaic_0001>

<bundles_post_ra>
// kernel: tpu_custom_call.1
= control target key start
LH: loop header
LB: loop body
LE: loop exit
PB: predicated region body
PF: predicated region fallthrough
CT: control target
= control target key end

     0   :  { %8 = vsyncpa [#allocation3], 0  ;;  %s1532_s0 = inlined_call_operand.hbm [shape: bf16[16,32], index: 0, kind: input, shape index: {}]   ;;  %s1533_s1 = inlined_call_operand.hbm [shape: bf16[928,128], index: 1, kind: input, shape index: {}]   ;;  %s1534_s2 = inlined_call_operand.hbm [shape: f32[8,128], index: 2, kind: input, shape index: {}]   ;;  %s1535_s3 = inlined_call_operand.hbm [shape: f32[16,128], index: 3, kind: output, shape index: {}]  }
   0x1   :  { %9 = vsyncpa [#allocation6], 0 }
   0x2   :  { %10 = vsyncpa [#allocation4], 0  ;;  %s1402_s12 = smov [#allocation5]   ;;  %s1403_s14 = smov [#allocation2]  }
   0x3   :  { %s28_s13 = sshll.u32 %s1402_s12, 4  ;;  %s16_s15 = sshll.u32 %s1403_s14, 4  ;;  %s29_s13 = int_to_ptr.vmem [resolvable:$true] %s28_s13  ;;  %s17_s15 = int_to_ptr.vmem [resolvable:$true] %s16_s15 }
   0x4   :  { %s1324_s16 = scalar_lea.vmem %s29_s13, 7424  ;;  %p1329_p1 = scmp.lt.s32.totalorder %s29_s13, %s29_s13 }
   0x5   :  { %p1325_p0 = scmp.ne.s32.totalorder %s29_s13, %s1324_s16  ;;  %p1330_p2 = scmp.lt.s32.totalorder %s1324_s16, %s1324_s16 }
   0x7   :  { %p1331_p3 = por %p1330_p2, %p1329_p1 }
   0x9   :  { %p1332_p4 = pnand %p1331_p3, %p1325_p0 }
   0xb   :  { %1335 = shalt.err (!%p1332_p4)
}
   0xc   :  { %s1404_s17 = smov 64   ;;  %s1405_s18 = smov 4  }
   0xd   :  { %34 = dma.hbm_to_vmem [thread:$0]  %s1533_s1, 7424, %s29_s13, [#allocation6], %s1404_s17, %s1404_s17, %s1405_s18  }
   0xe   :  { %s1344_s21 = scalar_lea.vmem %s17_s15, 128  ;;  %p1349_p6 = scmp.lt.s32.totalorder %s17_s15, %s17_s15 }
   0xf   :  { %p1345_p5 = scmp.ne.s32.totalorder %s17_s15, %s1344_s21  ;;  %p1350_p7 = scmp.lt.s32.totalorder %s1344_s21, %s1344_s21 }
  0x11   :  { %p1351_p8 = por %p1350_p7, %p1349_p6 }
  0x13   :  { %p1352_p9 = pnand %p1351_p8, %p1345_p5 }
  0x15   :  { %1355 = shalt.err (!%p1352_p9)
}
  0x16   :  { %22 = dma.hbm_to_vmem [thread:$0]  %s1532_s0, 128, %s17_s15, [#allocation3], %s1404_s17, %s1404_s17, %s1405_s18  }
  0x17   :  { %s1406_s24 = smov [#allocation7]  }
  0x18   :  { %s41_s25 = sshll.u32 %s1406_s24, 4  ;;  %s42_s25 = int_to_ptr.vmem [resolvable:$true] %s41_s25 }
  0x19   :  { %s1364_s26 = scalar_lea.vmem %s42_s25, 128  ;;  %p1369_p11 = scmp.lt.s32.totalorder %s42_s25, %s42_s25 }
  0x1a   :  { %p1365_p10 = scmp.ne.s32.totalorder %s42_s25, %s1364_s26  ;;  %p1370_p12 = scmp.lt.s32.totalorder %s1364_s26, %s1364_s26 }
  0x1c   :  { %p1371_p13 = por %p1370_p12, %p1369_p11 }
  0x1e   :  { %p1372_p0 = pnand %p1371_p13, %p1365_p10 }
  0x20   :  { %1375 = shalt.err (!%p1372_p0)
}
  0x21   :  { %44 = dma.hbm_to_vmem [thread:$0]  %s1534_s2, 128, %s42_s25, [#allocation6]  }
  0x22   :  { %1396 = dma.done.wait [#allocation3], 128  }
  0x23   :  { %1397 = vsyncadd [#allocation3], 4294967168 }
  0x24   :  { %1398 = dma.done.wait [#allocation6], 7552  }
  0x25   :  { %1399 = vsyncadd [#allocation6], 4294959744  ;;  %v1407_v0 = vmov 0.0   ;;  %vm1408_vm0 = vmmov 0   ;;  %v1249_v1 = vld [vmem:[#allocation5 + $0x8] sm:$0xff]   ;;  %v1250_v2 = vld [vmem:[#allocation5] sm:$0xff]  }
  0x26   :  { %1091 = vmatprep.subr.bf16.mxu0 %v1407_v0  ;;  %1095 = vmatprep.mubr.msk.bf16.mxu0 %vm1408_vm0, %v1407_v0  ;;  %v1252_v3 = vld [vmem:[#allocation5 + $0x48] sm:$0xff]   ;;  %v1251_v4 = vld [vmem:[#allocation2] sm:$0xff]   ;;  %v1253_v5 = vld [vmem:[#allocation5 + $0x40] sm:$0xff]   ;;  %vm83_vm1 = vcmask 261120   ;;  %s1409_s0 = smov [#allocation8]  }
  0x27   :  { %1099 = vmatprep.subr.bf16.mxu1 %v1407_v0  ;;  %1115 = vmatprep.mubr.msk.bf16.mxu1 %vm1408_vm0, %v1407_v0  ;;  %v1254_v6 = vld [vmem:[#allocation5 + $0x38] sm:$0xff]   ;;  %v1255_v7 = vld [vmem:[#allocation5 + $0x30] sm:$0xff]   ;;  %v1256_v8 = vld [vmem:[#allocation5 + $0x28] sm:$0xff]   ;;  %s942_s2 = sshll.u32 %s1409_s0, 4  ;;  %s943_s2 = int_to_ptr.vmem [resolvable:$true] %s942_s2 }
  0x28   :  { %1092 = vmatpush3.bf16.msra.mxu0 %v1249_v1  ;;  %1100 = vmatpush3.bf16.msra.mxu1 %v1252_v3  ;;  %v1257_v9 = vld [vmem:[#allocation5 + $0x20] sm:$0xff]   ;;  %v1258_v10 = vld [vmem:[#allocation5 + $0x18] sm:$0xff]   ;;  %v1259_v11 = vld [vmem:[#allocation5 + $0x10] sm:$0xff]   ;;  %s1376_s28 = scalar_lea.vmem %s943_s2, 256  ;;  %p1381_p2 = scmp.lt.s32.totalorder %s943_s2, %s943_s2 }
  0x29   :  { %1093 = vmatprep.subr.bf16.mxu0 %v1407_v0  ;;  %1101 = vmatprep.subr.bf16.mxu1 %v1407_v0  ;;  %v1260_v12 = vld [vmem:[#allocation5 + $0x88] sm:$0xff]   ;;  %v1261_v13 = vld [vmem:[#allocation5 + $0x80] sm:$0xff]   ;;  %v1262_v14 = vld [vmem:[#allocation5 + $0x78] sm:$0xff]   ;;  %p1377_p1 = scmp.ne.s32.totalorder %s943_s2, %s1376_s28  ;;  %p1382_p3 = scmp.lt.s32.totalorder %s1376_s28, %s1376_s28 }
  0x2a   :  { %v1263_v15 = vld [vmem:[#allocation5 + $0x70] sm:$0xff]   ;;  %v1264_v16 = vld [vmem:[#allocation5 + $0x68] sm:$0xff]   ;;  %v1265_v27 = vld [vmem:[#allocation5 + $0x60] sm:$0xff]  }
  0x2b   :  { %v955_v17 = vld [vmem:[#allocation7] ss:$0 sm:$0xff]  ;;  %v1266_v28 = vld [vmem:[#allocation5 + $0x58] sm:$0xff]   ;;  %v1268_v30 = vld [vmem:[#allocation5 + $0xc8] sm:$0xff]   ;;  %p1383_p4 = por %p1382_p3, %p1381_p2 }
  0x2c   :  { %1094 = vmatpush3.bf16.msra.mxu0 %v1250_v2  ;;  %1102 = vmatpush3.bf16.msra.mxu1 %v1253_v5  ;;  %v1267_v29 = vld [vmem:[#allocation5 + $0x50] sm:$0xff]   ;;  %v1269_v31 = vld [vmem:[#allocation5 + $0xc0] sm:$0xff]   ;;  %v1270_v32 = vld [vmem:[#allocation5 + $0xb8] sm:$0xff]  }
  0x2d   :  { %1119 = vmatprep.subr.bf16.mxu0 %v1407_v0  ;;  %1103 = vmatprep.subr.bf16.mxu1 %v1407_v0  ;;  %v1271_v33 = vld [vmem:[#allocation5 + $0xb0] sm:$0xff]   ;;  %v1272_v34 = vld [vmem:[#allocation5 + $0xa8] sm:$0xff]   ;;  %v1273_v45 = vld [vmem:[#allocation5 + $0xa0] sm:$0xff]   ;;  %p1384_p5 = pnand %p1383_p4, %p1377_p1 }
  0x2e   :  { %v960_v35 = vld [vmem:[#allocation7 + $0x1] ss:$0 sm:$0xff]  ;;  %v1274_v46 = vld [vmem:[#allocation5 + $0x98] sm:$0xff]   ;;  %v969_v48 = vld [vmem:[#allocation7 + $0x2] ss:$0 sm:$0xff] }
  0x2f   :  { %1096 = vmatmul.mubr.msk.bf16.vlgmr.msra.gmra.mxu0 %vm83_vm1, %v1251_v4  ;;  %v1275_v47 = vld [vmem:[#allocation5 + $0x90] sm:$0xff]   ;;  %v1276_v60 = vld [vmem:[#allocation5 + $0x108] sm:$0xff]   ;;  %v1277_v61 = vld [vmem:[#allocation5 + $0x100] sm:$0xff]  }
  0x30   :  { %1135 = vmatprep.mubr.msk.bf16.mxu0 %vm1408_vm0, %v1407_v0  ;;  %1104 = vmatpush3.bf16.msra.mxu1 %v1254_v6  ;;  %v1278_v62 = vld [vmem:[#allocation5 + $0xf8] sm:$0xff]   ;;  %v1279_v63 = vld [vmem:[#allocation5 + $0xf0] sm:$0xff]   ;;  %v1280_v1 = vld [vmem:[#allocation5 + $0xe8] sm:$0xff]  }
  0x31   :  { %1105 = vmatprep.subr.bf16.mxu1 %v1407_v0  ;;  %1120 = vmatpush3.bf16.msra.mxu0 %v1260_v12  ;;  %v1281_v2 = vld [vmem:[#allocation5 + $0xe0] sm:$0xff]   ;;  %v1282_v3 = vld [vmem:[#allocation5 + $0xd8] sm:$0xff]   ;;  %v1283_v4 = vld [vmem:[#allocation5 + $0xd0] sm:$0xff]  }
  0x32   :  { %1121 = vmatprep.subr.bf16.mxu0 %v1407_v0  ;;  %v1284_v5 = vld [vmem:[#allocation5 + $0x148] sm:$0xff]   ;;  %v1285_v6 = vld [vmem:[#allocation5 + $0x140] sm:$0xff]  }
  0x34   :  { %1106 = vmatpush3.bf16.msra.mxu1 %v1255_v7  ;;  %v1286_v7 = vld [vmem:[#allocation5 + $0x138] sm:$0xff]  }
  0x35   :  { %1107 = vmatprep.subr.bf16.mxu1 %v1407_v0  ;;  %1122 = vmatpush3.bf16.msra.mxu0 %v1261_v13 }
  0x36   :  { %1123 = vmatprep.subr.bf16.mxu0 %v1407_v0 }
  0x38   :  { %1108 = vmatpush3.bf16.msra.mxu1 %v1256_v8  ;;  %v1287_v8 = vld [vmem:[#allocation5 + $0x130] sm:$0xff]  }
  0x39   :  { %1109 = vmatprep.subr.bf16.mxu1 %v1407_v0  ;;  %1124 = vmatpush3.bf16.msra.mxu0 %v1262_v14 }
  0x3a   :  { %1125 = vmatprep.subr.bf16.mxu0 %v1407_v0 }
  0x3c   :  { %1110 = vmatpush3.bf16.msra.mxu1 %v1257_v9  ;;  %v1288_v9 = vld [vmem:[#allocation5 + $0x128] sm:$0xff]  }
  0x3d   :  { %1111 = vmatprep.subr.bf16.mxu1 %v1407_v0  ;;  %1126 = vmatpush3.bf16.msra.mxu0 %v1263_v15 }
  0x3e   :  { %1127 = vmatprep.subr.bf16.mxu0 %v1407_v0 }
  0x40   :  { %1112 = vmatpush3.bf16.msra.mxu1 %v1258_v10  ;;  %v978_v10 = vld [vmem:[#allocation7 + $0x3] ss:$0 sm:$0xff] }
  0x41   :  { %1113 = vmatprep.subr.bf16.mxu1 %v1407_v0  ;;  %1128 = vmatpush3.bf16.msra.mxu0 %v1264_v16 }
  0x42   :  { %1129 = vmatprep.subr.bf16.mxu0 %v1407_v0 }
  0x44   :  { %1114 = vmatpush3.bf16.msra.mxu1 %v1259_v11 }
  0x45   :  { %1139 = vmatprep.subr.bf16.mxu1 %v1407_v0  ;;  %1130 = vmatpush3.bf16.msra.mxu0 %v1265_v27 }
  0x46   :  { %1131 = vmatprep.subr.bf16.mxu0 %v1407_v0 }
  0x49   :  { %1132 = vmatpush3.bf16.msra.mxu0 %v1266_v28  ;;  %v1289_v28 = vld [vmem:[#allocation5 + $0x120] sm:$0xff]  }
  0x4a   :  { %1133 = vmatprep.subr.bf16.mxu0 %v1407_v0 }
  0x4d   :  { %1134 = vmatpush3.bf16.msra.mxu0 %v1267_v29  ;;  %v1290_v29 = vld [vmem:[#allocation5 + $0x118] sm:$0xff]  }
  0x4e   :  { %1159 = vmatprep.subr.bf16.mxu0 %v1407_v0 }
  0xef   :  { %v121_v18 = vpop.f32.mrf.mxu0 }
  0xf0   :  { %v122_v20 = vadd.f32 %v955_v17, %v121_v18 }
  0xf1   :  { %v1097_v19 = vpop.f32.mrf.mxu0 }
  0xf2   :  { %v128_v24 = vmax.f32 %v122_v20, 0.0 }
  0xf3   :  { %v124_v21 = vpop.f32.mrf.mxu0 }
  0xf4   :  { %v125_v22 = vadd.f32 %v955_v17, %v124_v21 }
  0xf5   :  { %v1098_v23 = vpop.f32.mrf.mxu0 }
  0xf6   :  { %v129_v25 = vmax.f32 %v125_v22, 0.0 }
  0xf8   :  { %v146_v26 = vpack.c.bf16 %v129_v25, %v128_v24 }
  0xfa   :  { %1116 = vmatmul.mubr.bf16.vlgmr.msra.gmra.mxu1 %v146_v26 }
  0xfb   :  { %1155 = vmatprep.mubr.msk.bf16.mxu1 %vm1408_vm0, %v1407_v0  ;;  %1140 = vmatpush3.bf16.msra.mxu1 %v1268_v30  ;;  %v1291_v30 = vld [vmem:[#allocation5 + $0x110] sm:$0xff]  }
  0xfc   :  { %1141 = vmatprep.subr.bf16.mxu1 %v1407_v0 }
  0xff   :  { %1142 = vmatpush3.bf16.msra.mxu1 %v1269_v31  ;;  %v1292_v31 = vld [vmem:[#allocation5 + $0x188] sm:$0xff]  }
 0x100   :  { %1143 = vmatprep.subr.bf16.mxu1 %v1407_v0 }
 0x103   :  { %1144 = vmatpush3.bf16.msra.mxu1 %v1270_v32  ;;  %v1293_v32 = vld [vmem:[#allocation5 + $0x180] sm:$0xff]  }
 0x104   :  { %1145 = vmatprep.subr.bf16.mxu1 %v1407_v0 }
 0x107   :  { %1146 = vmatpush3.bf16.msra.mxu1 %v1271_v33  ;;  %v1294_v33 = vld [vmem:[#allocation5 + $0x178] sm:$0xff]  }
 0x108   :  { %1147 = vmatprep.subr.bf16.mxu1 %v1407_v0 }
 0x10b   :  { %1148 = vmatpush3.bf16.msra.mxu1 %v1272_v34  ;;  %v1295_v34 = vld [vmem:[#allocation5 + $0x170] sm:$0xff]  }
 0x10c   :  { %1149 = vmatprep.subr.bf16.mxu1 %v1407_v0 }
 0x10f   :  { %1150 = vmatpush3.bf16.msra.mxu1 %v1273_v45 }
 0x110   :  { %1151 = vmatprep.subr.bf16.mxu1 %v1407_v0 }
 0x113   :  { %1152 = vmatpush3.bf16.msra.mxu1 %v1274_v46  ;;  %v1297_v46 = vld [vmem:[#allocation5 + $0x160] sm:$0xff]  }
 0x114   :  { %1153 = vmatprep.subr.bf16.mxu1 %v1407_v0 }
 0x117   :  { %1154 = vmatpush3.bf16.msra.mxu1 %v1275_v47  ;;  %v1298_v47 = vld [vmem:[#allocation5 + $0x158] sm:$0xff]  }
 0x118   :  { %1179 = vmatprep.subr.bf16.mxu1 %v1407_v0 }
 0x1ba   :  { %v234_v36 = vpop.f32.mrf.mxu1 }
 0x1bb   :  { %v235_v38 = vadd.f32 %v960_v35, %v234_v36  ;;  %v989_v36 = vld [vmem:[#allocation7 + $0x4] ss:$0 sm:$0xff] }
 0x1bc   :  { %v1117_v37 = vpop.f32.mrf.mxu1 }
 0x1bd   :  { %v241_v42 = vmax.f32 %v235_v38, 0.0 }
 0x1be   :  { %v237_v39 = vpop.f32.mrf.mxu1 }
 0x1bf   :  { %v238_v40 = vadd.f32 %v960_v35, %v237_v39  ;;  %v1296_v35 = vld [vmem:[#allocation5 + $0x168] sm:$0xff]  }
 0x1c0   :  { %v1118_v41 = vpop.f32.mrf.mxu1 }
 0x1c1   :  { %v242_v43 = vmax.f32 %v238_v40, 0.0 }
 0x1c3   :  { %v259_v44 = vpack.c.bf16 %v242_v43, %v241_v42 }
 0x1c5   :  { %1136 = vmatmul.mubr.bf16.vlgmr.msra.gmra.mxu0 %v259_v44 }
 0x1c6   :  { %1175 = vmatprep.mubr.msk.bf16.mxu0 %vm1408_vm0, %v1407_v0  ;;  %1160 = vmatpush3.bf16.msra.mxu0 %v1276_v60 }
 0x1c7   :  { %1161 = vmatprep.subr.bf16.mxu0 %v1407_v0 }
 0x1ca   :  { %1162 = vmatpush3.bf16.msra.mxu0 %v1277_v61 }
 0x1cb   :  { %1163 = vmatprep.subr.bf16.mxu0 %v1407_v0 }
 0x1ce   :  { %1164 = vmatpush3.bf16.msra.mxu0 %v1278_v62 }
 0x1cf   :  { %1165 = vmatprep.subr.bf16.mxu0 %v1407_v0 }
 0x1d2   :  { %1166 = vmatpush3.bf16.msra.mxu0 %v1279_v63 }
 0x1d3   :  { %1167 = vmatprep.subr.bf16.mxu0 %v1407_v0 }
 0x1d6   :  { %1168 = vmatpush3.bf16.msra.mxu0 %v1280_v1 }
 0x1d7   :  { %1169 = vmatprep.subr.bf16.mxu0 %v1407_v0 }
 0x1da   :  { %1170 = vmatpush3.bf16.msra.mxu0 %v1281_v2 }
 0x1db   :  { %1171 = vmatprep.subr.bf16.mxu0 %v1407_v0 }
 0x1de   :  { %1172 = vmatpush3.bf16.msra.mxu0 %v1282_v3  ;;  %v1305_v3 = vld [vmem:[#allocation5 + $0x1a0] sm:$0xff]  }
 0x1df   :  { %1173 = vmatprep.subr.bf16.mxu0 %v1407_v0 }
 0x1e2   :  { %1174 = vmatpush3.bf16.msra.mxu0 %v1283_v4  ;;  %v1306_v4 = vld [vmem:[#allocation5 + $0x198] sm:$0xff]  }
 0x1e3   :  { %1199 = vmatprep.subr.bf16.mxu0 %v1407_v0 }
 0x285   :  { %v347_v49 = vpop.f32.mrf.mxu0 }
 0x286   :  { %v348_v50 = vadd.f32 %v969_v48, %v347_v49  ;;  %v1300_v49 = vld [vmem:[#allocation5 + $0x1c8] sm:$0xff]  }
 0x287   :  { %v1137_v51 = vpop.f32.mrf.mxu0 }
 0x288   :  { %v1479_v53 = vadd.f32 %v348_v50, %v128_v24  ;;  %v1301_v50 = vld [vmem:[#allocation5 + $0x1c0] sm:$0xff]   ;;  %v1302_v51 = vld [vmem:[#allocation5 + $0x1b8] sm:$0xff]  }
 0x289   :  { %v350_v52 = vpop.f32.mrf.mxu0 }
 0x28a   :  { %v351_v54 = vadd.f32 %v969_v48, %v350_v52  ;;  %v356_v57 = vmax.f32 %v1479_v53, 0.0  ;;  %v1299_v48 = vld [vmem:[#allocation5 + $0x150] sm:$0xff]   ;;  %v1304_v53 = vld [vmem:[#allocation5 + $0x1a8] sm:$0xff]  }
 0x28b   :  { %v1138_v55 = vpop.f32.mrf.mxu0  ;;  %v1303_v52 = vld [vmem:[#allocation5 + $0x1b0] sm:$0xff]  }
 0x28c   :  { %v1481_v56 = vadd.f32 %v351_v54, %v129_v25  ;;  %v998_v54 = vld [vmem:[#allocation7 + $0x5] ss:$0 sm:$0xff] }
 0x28e   :  { %v357_v58 = vmax.f32 %v1481_v56, 0.0 }
 0x290   :  { %v374_v59 = vpack.c.bf16 %v357_v58, %v356_v57 }
 0x292   :  { %1156 = vmatmul.mubr.bf16.vlgmr.msra.gmra.mxu1 %v374_v59 }
 0x293   :  { %1195 = vmatprep.mubr.msk.bf16.mxu1 %vm1408_vm0, %v1407_v0  ;;  %1180 = vmatpush3.bf16.msra.mxu1 %v1284_v5  ;;  %v1307_v5 = vld [vmem:[#allocation5 + $0x190] sm:$0xff]  }
 0x294   :  { %1181 = vmatprep.subr.bf16.mxu1 %v1407_v0 }
 0x297   :  { %1182 = vmatpush3.bf16.msra.mxu1 %v1285_v6  ;;  %v1007_v6 = vld [vmem:[#allocation7 + $0x6] ss:$0 sm:$0xff] }
 0x298   :  { %1183 = vmatprep.subr.bf16.mxu1 %v1407_v0 }
 0x29b   :  { %1184 = vmatpush3.bf16.msra.mxu1 %v1286_v7 }
 0x29c   :  { %1185 = vmatprep.subr.bf16.mxu1 %v1407_v0 }
 0x29f   :  { %1186 = vmatpush3.bf16.msra.mxu1 %v1287_v8 }
 0x2a0   :  { %1187 = vmatprep.subr.bf16.mxu1 %v1407_v0 }
 0x2a3   :  { %1188 = vmatpush3.bf16.msra.mxu1 %v1288_v9 }
 0x2a4   :  { %1189 = vmatprep.subr.bf16.mxu1 %v1407_v0 }
 0x2a7   :  { %1190 = vmatpush3.bf16.msra.mxu1 %v1289_v28 }
 0x2a8   :  { %1191 = vmatprep.subr.bf16.mxu1 %v1407_v0 }
 0x2ab   :  { %1192 = vmatpush3.bf16.msra.mxu1 %v1290_v29 }
 0x2ac   :  { %1193 = vmatprep.subr.bf16.mxu1 %v1407_v0 }
 0x2af   :  { %1194 = vmatpush3.bf16.msra.mxu1 %v1291_v30 }
 0x2b0   :  { %1219 = vmatprep.subr.bf16.mxu1 %v1407_v0 }
 0x352   :  { %v462_v11 = vpop.f32.mrf.mxu1 }
 0x353   :  { %v463_v12 = vadd.f32 %v978_v10, %v462_v11 }
 0x354   :  { %v1157_v13 = vpop.f32.mrf.mxu1 }
 0x355   :  { %v987_v14 = vmul.f32 -1.442695, %v463_v12 }
 0x356   :  { %v465_v15 = vpop.f32.mrf.mxu1 }
 0x357   :  { %1308 = vpow2.f32 %v987_v14  ;;  %v466_v16 = vadd.f32 %v978_v10, %v465_v15 }
 0x358   :  { %v1158_v17 = vpop.f32.mrf.mxu1 }
 0x359   :  { %v988_v18 = vmul.f32 -1.442695, %v466_v16  ;;  %v1016_v16 = vld [vmem:[#allocation7 + $0x7] ss:$0 sm:$0xff] }
 0x35b   :  { %1310 = vpow2.f32 %v988_v18 }
 0x364   :  { %v1309_v19 = vpop.eup %1308 }
 0x365   :  { %v475_v20 = vadd.f32 1.0, %v1309_v19 }
 0x367   :  { %1312 = vrcp.f32 %v475_v20 }
 0x368   :  { %v1311_v21 = vpop.eup %1310 }
 0x369   :  { %v476_v22 = vadd.f32 1.0, %v1311_v21 }
 0x36b   :  { %1314 = vrcp.f32 %v476_v22 }
 0x374   :  { %v1313_v23 = vpop.eup %1312 }
 0x375   :  { %v481_v25 = vmul.f32 %v1313_v23, %v356_v57 }
 0x378   :  { %v1315_v24 = vpop.eup %1314 }
 0x379   :  { %v482_v26 = vmul.f32 %v1315_v24, %v357_v58 }
 0x37b   :  { %v499_v27 = vpack.c.bf16 %v482_v26, %v481_v25 }
 0x37d   :  { %1176 = vmatmul.mubr.bf16.vlgmr.msra.gmra.mxu0 %v499_v27 }
 0x37e   :  { %1215 = vmatprep.mubr.msk.bf16.mxu0 %vm1408_vm0, %v1407_v0  ;;  %1200 = vmatpush3.bf16.msra.mxu0 %v1292_v31 }
 0x37f   :  { %1201 = vmatprep.subr.bf16.mxu0 %v1407_v0 }
 0x382   :  { %1202 = vmatpush3.bf16.msra.mxu0 %v1293_v32 }
 0x383   :  { %1203 = vmatprep.subr.bf16.mxu0 %v1407_v0 }
 0x386   :  { %1204 = vmatpush3.bf16.msra.mxu0 %v1294_v33 }
 0x387   :  { %1205 = vmatprep.subr.bf16.mxu0 %v1407_v0 }
 0x38a   :  { %1206 = vmatpush3.bf16.msra.mxu0 %v1295_v34 }
 0x38b   :  { %1207 = vmatprep.subr.bf16.mxu0 %v1407_v0 }
 0x38e   :  { %1208 = vmatpush3.bf16.msra.mxu0 %v1296_v35 }
 0x38f   :  { %1209 = vmatprep.subr.bf16.mxu0 %v1407_v0 }
 0x392   :  { %1210 = vmatpush3.bf16.msra.mxu0 %v1297_v46 }
 0x393   :  { %1211 = vmatprep.subr.bf16.mxu0 %v1407_v0 }
 0x396   :  { %1212 = vmatpush3.bf16.msra.mxu0 %v1298_v47 }
 0x397   :  { %1213 = vmatprep.subr.bf16.mxu0 %v1407_v0 }
 0x39a   :  { %1214 = vmatpush3.bf16.msra.mxu0 %v1299_v48 }
 0x43d   :  { %v587_v37 = vpop.f32.mrf.mxu0 }
 0x43e   :  { %v588_v39 = vadd.f32 %v989_v36, %v587_v37 }
 0x43f   :  { %v1177_v38 = vpop.f32.mrf.mxu0 }
 0x440   :  { %v594_v43 = vmax.f32 %v588_v39, 0.0 }
 0x441   :  { %v590_v40 = vpop.f32.mrf.mxu0 }
 0x442   :  { %v591_v41 = vadd.f32 %v989_v36, %v590_v40 }
 0x443   :  { %v1178_v42 = vpop.f32.mrf.mxu0 }
 0x444   :  { %v595_v44 = vmax.f32 %v591_v41, 0.0 }
 0x446   :  { %v612_v45 = vpack.c.bf16 %v595_v44, %v594_v43 }
 0x448   :  { %1196 = vmatmul.mubr.bf16.vlgmr.msra.gmra.mxu1 %v612_v45 }
 0x449   :  { %1235 = vmatprep.mubr.msk.bf16.mxu1 %vm1408_vm0, %v1407_v0  ;;  %1220 = vmatpush3.bf16.msra.mxu1 %v1300_v49 }
 0x44a   :  { %1221 = vmatprep.subr.bf16.mxu1 %v1407_v0 }
 0x44d   :  { %1222 = vmatpush3.bf16.msra.mxu1 %v1301_v50 }
 0x44e   :  { %1223 = vmatprep.subr.bf16.mxu1 %v1407_v0 }
 0x451   :  { %1224 = vmatpush3.bf16.msra.mxu1 %v1302_v51 }
 0x452   :  { %1225 = vmatprep.subr.bf16.mxu1 %v1407_v0 }
 0x455   :  { %1226 = vmatpush3.bf16.msra.mxu1 %v1303_v52 }
 0x456   :  { %1227 = vmatprep.subr.bf16.mxu1 %v1407_v0 }
 0x459   :  { %1228 = vmatpush3.bf16.msra.mxu1 %v1304_v53 }
 0x45a   :  { %1229 = vmatprep.subr.bf16.mxu1 %v1407_v0 }
 0x45d   :  { %1230 = vmatpush3.bf16.msra.mxu1 %v1305_v3 }
 0x45e   :  { %1231 = vmatprep.subr.bf16.mxu1 %v1407_v0 }
 0x461   :  { %1232 = vmatpush3.bf16.msra.mxu1 %v1306_v4 }
 0x462   :  { %1233 = vmatprep.subr.bf16.mxu1 %v1407_v0 }
 0x465   :  { %1234 = vmatpush3.bf16.msra.mxu1 %v1307_v5 }
 0x508   :  { %v700_v55 = vpop.f32.mrf.mxu1 }
 0x509   :  { %v701_v56 = vadd.f32 %v998_v54, %v700_v55 }
 0x50a   :  { %v1197_v57 = vpop.f32.mrf.mxu1 }
 0x50b   :  { %v707_v59 = vadd.f32 %v701_v56, %v588_v39 }
 0x50c   :  { %v703_v58 = vpop.f32.mrf.mxu1 }
 0x50d   :  { %v704_v60 = vadd.f32 %v998_v54, %v703_v58  ;;  %v709_v63 = vmax.f32 %v707_v59, 0.0 }
 0x50e   :  { %v1198_v61 = vpop.f32.mrf.mxu1 }
 0x50f   :  { %v708_v62 = vadd.f32 %v704_v60, %v591_v41 }
 0x511   :  { %v710_v1 = vmax.f32 %v708_v62, 0.0 }
 0x513   :  { %v727_v2 = vpack.c.bf16 %v710_v1, %v709_v63 }
 0x515   :  { %1216 = vmatmul.mubr.bf16.vlgmr.msra.gmra.mxu0 %v727_v2 }
 0x5d5   :  { %v815_v7 = vpop.f32.mrf.mxu0 }
 0x5d6   :  { %v816_v9 = vadd.f32 %v1007_v6, %v815_v7 }
 0x5d7   :  { %v1217_v8 = vpop.f32.mrf.mxu0 }
 0x5d8   :  { %v822_v13 = vmax.f32 %v816_v9, 0.0 }
 0x5d9   :  { %v818_v10 = vpop.f32.mrf.mxu0 }
 0x5da   :  { %v819_v11 = vadd.f32 %v1007_v6, %v818_v10 }
 0x5db   :  { %v1218_v12 = vpop.f32.mrf.mxu0 }
 0x5dc   :  { %v823_v14 = vmax.f32 %v819_v11, 0.0 }
 0x5de   :  { %v840_v15 = vpack.c.bf16 %v823_v14, %v822_v13 }
 0x5e0   :  { %1236 = vmatmul.mubr.bf16.vlgmr.msra.gmra.mxu1 %v840_v15 }
 0x6a0   :  { %v928_v17 = vpop.f32.mrf.mxu1 }
 0x6a1   :  { %v929_v18 = vadd.f32 %v1016_v16, %v928_v17 }
 0x6a2   :  { %v1237_v19 = vpop.f32.mrf.mxu1 }
 0x6a3   :  { %935 = vst [vmem:[#allocation8] sm:$0xff] %v929_v18 }
 0x6a4   :  { %v931_v0 = vpop.f32.mrf.mxu1 }
 0x6a5   :  { %v932_v20 = vadd.f32 %v1016_v16, %v931_v0 }
 0x6a6   :  { %v1238_v21 = vpop.f32.mrf.mxu1 }
 0x6a7   :  { %936 = vst [vmem:[#allocation8 + $0x8] sm:$0xff] %v932_v20 }
 0x6a8   :  { %1387 = shalt.err (!%p1384_p5)
}
 0x6a9   :  { %s1410_s29 = smov 128   ;;  %s1411_s30 = smov 8  }
 0x6aa   :  { %948 = dma.vmem_to_hbm [thread:$0]  %s943_s2, 256, %s1535_s3, [#allocation4], %s1410_s29, %s1410_s29, %s1411_s30  }
 0x6ab   :  { %1400 = dma.done.wait [#allocation4], 256  }
 0x6ac   :  { %1401 = vsyncadd [#allocation4], 4294967040 }
 0x6ad   :  { %952 = vsyncpa [#allocation3], 1 }
 0x6ae   :  { %953 = vsyncpa [#allocation6], 1 }
 0x6af   :  { %954 = vsyncpa [#allocation4], 1 }

</bundles_post_ra>
